<compile_context>
chip_gen: v7x
topology: tpu7x:2x2x1
jax: 0.10.0
libtpu: 0.0.40
codegen_flags: <defaults>
</compile_context>

<pallas_src>
import functools

import jax
import jax.numpy as jnp
import numpy as np
from jax.experimental import pallas as pl
from jax.experimental.pallas import tpu as pltpu


VMEM_SPEC = pl.BlockSpec(memory_space=pltpu.MemorySpace.VMEM)
SMEM_SPEC = pl.BlockSpec(memory_space=pltpu.MemorySpace.SMEM)


# ----------------------------------------------------------------------------
# Fused per-layer kernel
# ----------------------------------------------------------------------------
def _gin_vn_layer_kernel(
    eps_ref,            # SMEM (1,)          GIN eps
    h_ref,              # (N, D)   f32       node features
    vn_ref,             # (Gp, D)  f32       virtual-node embeddings
    boh_ref,            # (N, Gp)  bf16      one-hot(batch)        (gather vn)
    boht_ref,           # (Gp, N)  bf16      one-hot(batch)^T      (pool)
    soh_ref,            # (E, N)   bf16      one-hot(src)          (gather x_j)
    doht_ref,           # (N, E)   bf16      one-hot(dst)^T        (scatter-add)
    ea_ref,             # (E, 8)   f32       edge_attr (padded 7->8)
    eew_ref,            # (8, D)             edge_encoder weight (padded)
    eeb_ref,            # (1, D)
    w1_ref,             # (D, 2D)            mlp.Linear1 (BN1 folded)
    b1_ref,             # (1, 2D)
    w2_ref,             # (2D, D)            mlp.Linear2 (outer BN folded)
    b2_ref,             # (1, D)
    vw1_ref,            # (D, 2D)            vn-MLP Linear1 (BN folded)
    vb1_ref,            # (1, 2D)
    vw2_ref,            # (2D, D)            vn-MLP Linear2 (BN folded)
    vb2_ref,            # (1, D)
    h_out_ref,          # (N, D)
    vn_out_ref,         # (Gp, D)
    *,
    last_layer,
):
    f32 = jnp.float32
    h = h_ref[...]
    vn = vn_ref[...]

    # h_list[layer] + virtualnode_embedding[batch]   (gather == one-hot matmul)
    h_vn = h + jnp.dot(boh_ref[...].astype(f32), vn, preferred_element_type=f32)

    # edge_encoder(edge_attr)
    edge_emb = (
        jnp.dot(ea_ref[...], eew_ref[...], preferred_element_type=f32) + eeb_ref[...]
    )

    # GIN message passing: msg = relu(x_j + edge_emb), aggr = 'add'
    msg = jnp.maximum(
        jnp.dot(soh_ref[...].astype(f32), h_vn, preferred_element_type=f32)
        + edge_emb,
        0.0,
    )
    agg = jnp.dot(doht_ref[...].astype(f32), msg, preferred_element_type=f32)

    eps = eps_ref[0]
    pre = (1.0 + eps) * h_vn + agg

    # GIN MLP (BN1 folded into w1/b1), then outer BatchNorm folded into w2/b2
    t = jnp.maximum(
        jnp.dot(pre, w1_ref[...], preferred_element_type=f32) + b1_ref[...], 0.0
    )
    h_new = jnp.dot(t, w2_ref[...], preferred_element_type=f32) + b2_ref[...]

    if not last_layer:
        h_new = jnp.maximum(h_new, 0.0)  # ReLU after outer BN (non-last layers)
        # virtual-node update: global_add_pool(h_vn, batch) + vn -> 2-layer MLP
        pooled = (
            jnp.dot(boht_ref[...].astype(f32), h_vn, preferred_element_type=f32) + vn
        )
        v1 = jnp.maximum(
            jnp.dot(pooled, vw1_ref[...], preferred_element_type=f32) + vb1_ref[...],
            0.0,
        )
        vn_out_ref[...] = jnp.maximum(
            jnp.dot(v1, vw2_ref[...], preferred_element_type=f32) + vb2_ref[...], 0.0
        )
    else:
        vn_out_ref[...] = vn  # pass-through (unused)

    h_out_ref[...] = h_new
    # dropout is identity in eval mode; residual=False


def gin_vn_layer(eps, h, vn, batch_oh, batch_oh_t, src_oh, dst_oh_t, ea,
                 eew, eeb, w1, b1, w2, b2, vw1, vb1, vw2, vb2, *, last_layer):
    n, d = h.shape
    g = vn.shape[0]
    return pl.pallas_call(
        functools.partial(_gin_vn_layer_kernel, last_layer=last_layer),
        out_shape=(
            jax.ShapeDtypeStruct((n, d), jnp.float32),
            jax.ShapeDtypeStruct((g, d), jnp.float32),
        ),
        in_specs=[SMEM_SPEC] + [VMEM_SPEC] * 17,
        out_specs=(VMEM_SPEC, VMEM_SPEC),
    )(
        eps, h, vn, batch_oh, batch_oh_t, src_oh, dst_oh_t, ea,
        eew, eeb.reshape(1, -1),
        w1, b1.reshape(1, -1), w2, b2.reshape(1, -1),
        vw1, vb1.reshape(1, -1), vw2, vb2.reshape(1, -1),
    )


# ----------------------------------------------------------------------------
# Parameter initialization (matches __init__ shapes; eval-mode BN stats)
# ----------------------------------------------------------------------------
def _bn_affine(dim):
    gamma = jnp.ones((dim,), jnp.float32)
    beta = jnp.zeros((dim,), jnp.float32)
    r_mean = jnp.zeros((dim,), jnp.float32)
    r_var = jnp.ones((dim,), jnp.float32)
    scale = gamma / jnp.sqrt(r_var + 1e-5)
    shift = beta - r_mean * scale
    return scale, shift


def _fold_bn(w, b, scale, shift):
    """Fold eval-mode BN affine into the preceding Linear (y = x@w' + b')."""
    return w * scale[None, :], b * scale + shift


def init_params(key, num_layer, emb_dim):
    d = emb_dim
    n_keys = 1 + 3 * num_layer + 2 * (num_layer - 1)   # exact count (bug fix)
    kit = iter(jax.random.split(key, n_keys))

    def lin(k, fan_in, fan_out):
        # weight stored transposed (fan_in, fan_out) for x @ W
        w = jax.random.normal(k, (fan_in, fan_out), jnp.float32) / jnp.sqrt(
            float(fan_in)
        )
        b = jnp.zeros((fan_out,), jnp.float32)
        return w, b

    params = {
        "node_enc": jax.random.normal(next(kit), (1, d), jnp.float32) * 0.1,
        "vn_emb": jnp.zeros((1, d), jnp.float32),  # constant_(0) init
        "convs": [],
        "bns": [],
        "vn_mlps": [],
    }
    for _ in range(num_layer):
        conv = {}
        conv["ee_w"], conv["ee_b"] = lin(next(kit), 7, d)          # edge_encoder
        conv["w1"], conv["b1"] = lin(next(kit), d, 2 * d)          # mlp.Linear1
        conv["bn1_scale"], conv["bn1_shift"] = _bn_affine(2 * d)   # mlp.BatchNorm
        conv["w2"], conv["b2"] = lin(next(kit), 2 * d, d)          # mlp.Linear2
        conv["eps"] = jnp.zeros((1,), jnp.float32)                 # GIN eps
        params["convs"].append(conv)
        params["bns"].append(_bn_affine(d))                        # outer BNs
    for _ in range(num_layer - 1):
        m = {}
        m["w1"], m["b1"] = lin(next(kit), d, 2 * d)
        m["bn1_scale"], m["bn1_shift"] = _bn_affine(2 * d)
        m["w2"], m["b2"] = lin(next(kit), 2 * d, d)
        m["bn2_scale"], m["bn2_shift"] = _bn_affine(d)
        params["vn_mlps"].append(m)
    return params


# ----------------------------------------------------------------------------
# Forward pass (GNN_node_Virtualnode, gnn_type='gin', eval mode)
# ----------------------------------------------------------------------------
def gnn_node_virtualnode_forward(params, x_idx, edge_index, edge_attr, batch,
                                 num_layer, num_graphs):
    n = x_idx.shape[0]
    d = params["node_enc"].shape[1]
    g_pad = ((num_graphs + 7) // 8) * 8  # sublane-friendly; padded graphs inert

    src, dst = edge_index[0], edge_index[1]
    # gather/scatter/pool operators as bf16 one-hots (0/1 exact in bf16)
    src_oh = jax.nn.one_hot(src, n, dtype=jnp.bfloat16)            # (E, N)
    dst_oh_t = jax.nn.one_hot(dst, n, dtype=jnp.bfloat16).T        # (N, E)
    batch_oh = jax.nn.one_hot(batch, g_pad, dtype=jnp.bfloat16)    # (N, Gp)
    batch_oh_t = batch_oh.T                                        # (Gp, N)
    ea_pad = jnp.pad(edge_attr, ((0, 0), (0, 1)))                  # (E, 8)

    # node_encoder(x)  (Embedding(1, D); x forced to int indices)
    h = params["node_enc"][x_idx]                                  # (N, D)
    # virtualnode_embedding(zeros(G))
    vn = jnp.broadcast_to(params["vn_emb"][0], (g_pad, d)).astype(jnp.float32)

    for layer in range(num_layer):
        conv = params["convs"][layer]
        is_last = layer == num_layer - 1

        # fold BN affines into the Linear weights (host side, once per layer)
        w1, b1 = _fold_bn(conv["w1"], conv["b1"],
                          conv["bn1_scale"], conv["bn1_shift"])
        bn_scale, bn_shift = params["bns"][layer]
        w2, b2 = _fold_bn(conv["w2"], conv["b2"], bn_scale, bn_shift)
        eew = jnp.pad(conv["ee_w"], ((0, 1), (0, 0)))              # (8, D)

        if not is_last:
            m = params["vn_mlps"][layer]
            vw1, vb1 = _fold_bn(m["w1"], m["b1"], m["bn1_scale"], m["bn1_shift"])
            vw2, vb2 = _fold_bn(m["w2"], m["b2"], m["bn2_scale"], m["bn2_shift"])
        else:
            vw1 = jnp.zeros((d, 2 * d), jnp.float32)
            vb1 = jnp.zeros((2 * d,), jnp.float32)
            vw2 = jnp.zeros((2 * d, d), jnp.float32)
            vb2 = jnp.zeros((d,), jnp.float32)

        h, vn = gin_vn_layer(
            conv["eps"], h, vn, batch_oh, batch_oh_t, src_oh, dst_oh_t, ea_pad,
            eew, conv["ee_b"], w1, b1, w2, b2, vw1, vb1, vw2, vb2,
            last_layer=is_last,
        )

    return h  # JK == 'last'


# ----------------------------------------------------------------------------
# Pure-JAX reference (scatter/segment based, unfolded BN) for validation
# ----------------------------------------------------------------------------
def reference_forward(params, x_idx, edge_index, edge_attr, batch,
                      num_layer, num_graphs):
    d = params["node_enc"].shape[1]
    n = x_idx.shape[0]
    src, dst = edge_index[0], edge_index[1]

    def lin(x, w, b, scale, shift, relu):
        y = (x @ w + b) * scale + shift
        return jnp.maximum(y, 0.0) if relu else y

    ones_d = jnp.ones((d,), jnp.float32)
    zeros_d = jnp.zeros((d,), jnp.float32)

    h = params["node_enc"][x_idx]
    vn = jnp.zeros((num_graphs, d), jnp.float32)
    for layer in range(num_layer):
        conv = params["convs"][layer]
        is_last = layer == num_layer - 1
        h_vn = h + vn[batch]
        edge_emb = lin(edge_attr, conv["ee_w"], conv["ee_b"], ones_d, zeros_d, False)
        msg = jnp.maximum(h_vn[src] + edge_emb, 0.0)
        agg = jnp.zeros((n, d), jnp.float32).at[dst].add(msg)
        pre = (1.0 + conv["eps"][0]) * h_vn + agg
        t = lin(pre, conv["w1"], conv["b1"], conv["bn1_scale"], conv["bn1_shift"], True)
        bn_scale, bn_shift = params["bns"][layer]
        h_new = lin(t, conv["w2"], conv["b2"], bn_scale, bn_shift, not is_last)
        if not is_last:
            pooled = jnp.zeros((num_graphs, d), jnp.float32).at[batch].add(h_vn)
            vn_temp = pooled + vn
            m = params["vn_mlps"][layer]
            v1 = lin(vn_temp, m["w1"], m["b1"], m["bn1_scale"], m["bn1_shift"], True)
            vn = lin(v1, m["w2"], m["b2"], m["bn2_scale"], m["bn2_shift"], True)
        h = h_new
    return h


# ----------------------------------------------------------------------------
if __name__ == "__main__":
    NUM_LAYER = 3
    EMB_DIM = 32
    N_NODES = 16
    N_EDGES = 32
    N_GRAPHS = 2

    key = jax.random.PRNGKey(0)
    k_param, k_e0, k_e1, k_attr = jax.random.split(key, 4)

    params = init_params(k_param, NUM_LAYER, EMB_DIM)

    # batched graph data: nodes 0..7 -> graph 0, nodes 8..15 -> graph 1
    x_idx = jnp.zeros((N_NODES,), jnp.int32)          # node_encoder has 1 row
    batch = jnp.concatenate(
        [jnp.zeros((8,), jnp.int32), jnp.ones((8,), jnp.int32)]
    )
    e0 = jax.random.randint(k_e0, (2, N_EDGES // 2), 0, 8)            # graph 0
    e1 = jax.random.randint(k_e1, (2, N_EDGES // 2), 8, 16)           # graph 1
    edge_index = jnp.concatenate([e0, e1], axis=1).astype(jnp.int32)  # (2, E)
    edge_attr = jax.random.normal(k_attr, (N_EDGES, 7), jnp.float32)

    out = gnn_node_virtualnode_forward(
        params, x_idx, edge_index, edge_attr, batch, NUM_LAYER, N_GRAPHS
    )
    out = jax.block_until_ready(out)

    ref = reference_forward(
        params, x_idx, edge_index, edge_attr, batch, NUM_LAYER, N_GRAPHS
    )
    np.testing.assert_allclose(np.asarray(out), np.asarray(ref), rtol=1e-2, atol=1e-2)
    assert out.shape == (N_NODES, EMB_DIM)
    print("KERNEL_OK")
</pallas_src>

<mosaic_0001>
module attributes {stable_mosaic.version = 11 : i64} {
  func.func @_gin_vn_layer_kernel(%arg0: memref<1xf32, #tpu.memory_space<smem>>, %arg1: memref<16x32xf32, #tpu.memory_space<vmem>>, %arg2: memref<8x32xf32, #tpu.memory_space<vmem>>, %arg3: memref<16x8xbf16, #tpu.memory_space<vmem>>, %arg4: memref<8x16xbf16, #tpu.memory_space<vmem>>, %arg5: memref<32x16xbf16, #tpu.memory_space<vmem>>, %arg6: memref<16x32xbf16, #tpu.memory_space<vmem>>, %arg7: memref<32x8xf32, #tpu.memory_space<vmem>>, %arg8: memref<8x32xf32, #tpu.memory_space<vmem>>, %arg9: memref<1x32xf32, #tpu.memory_space<vmem>>, %arg10: memref<32x64xf32, #tpu.memory_space<vmem>>, %arg11: memref<1x64xf32, #tpu.memory_space<vmem>>, %arg12: memref<64x32xf32, #tpu.memory_space<vmem>>, %arg13: memref<1x32xf32, #tpu.memory_space<vmem>>, %arg14: memref<32x64xf32, #tpu.memory_space<vmem>>, %arg15: memref<1x64xf32, #tpu.memory_space<vmem>>, %arg16: memref<64x32xf32, #tpu.memory_space<vmem>>, %arg17: memref<1x32xf32, #tpu.memory_space<vmem>>, %arg18: memref<16x32xf32, #tpu.memory_space<vmem>>, %arg19: memref<8x32xf32, #tpu.memory_space<vmem>>) attributes {dimension_semantics = [], scalar_prefetch = 0 : i64, scratch_operands = 0 : i64, tpu.core_type = #tpu.core_type<tc>} {
    %c0 = arith.constant 0 : index
    %c0_0 = arith.constant 0 : index
    %0 = vector.load %arg1[%c0, %c0_0] : memref<16x32xf32, #tpu.memory_space<vmem>>, vector<16x32xf32>
    %c0_1 = arith.constant 0 : index
    %c0_2 = arith.constant 0 : index
    %1 = vector.load %arg2[%c0_1, %c0_2] : memref<8x32xf32, #tpu.memory_space<vmem>>, vector<8x32xf32>
    %c0_3 = arith.constant 0 : index
    %c0_4 = arith.constant 0 : index
    %2 = vector.load %arg3[%c0_3, %c0_4] : memref<16x8xbf16, #tpu.memory_space<vmem>>, vector<16x8xbf16>
    %3 = arith.extf %2 : vector<16x8xbf16> to vector<16x8xf32>
    %cst = arith.constant dense<0.000000e+00> : vector<16x32xf32>
    %4 = tpu.matmul %3, %1, %cst {dimension_numbers = #tpu.dot_dimension_numbers<[1], [0], [0], [1], [0, 0, 1, 1], [], []>} : vector<16x8xf32>, vector<8x32xf32>, vector<16x32xf32> -> vector<16x32xf32>
    %5 = arith.addf %0, %4 : vector<16x32xf32>
    %c0_5 = arith.constant 0 : index
    %c0_6 = arith.constant 0 : index
    %6 = vector.load %arg7[%c0_5, %c0_6] : memref<32x8xf32, #tpu.memory_space<vmem>>, vector<32x8xf32>
    %c0_7 = arith.constant 0 : index
    %c0_8 = arith.constant 0 : index
    %7 = vector.load %arg8[%c0_7, %c0_8] : memref<8x32xf32, #tpu.memory_space<vmem>>, vector<8x32xf32>
    %cst_9 = arith.constant dense<0.000000e+00> : vector<32x32xf32>
    %8 = tpu.matmul %6, %7, %cst_9 {dimension_numbers = #tpu.dot_dimension_numbers<[1], [0], [0], [1], [0, 0, 1, 1], [], []>} : vector<32x8xf32>, vector<8x32xf32>, vector<32x32xf32> -> vector<32x32xf32>
    %c0_10 = arith.constant 0 : index
    %c0_11 = arith.constant 0 : index
    %9 = vector.load %arg9[%c0_10, %c0_11] : memref<1x32xf32, #tpu.memory_space<vmem>>, vector<1x32xf32>
    %10 = vector.broadcast %9 : vector<1x32xf32> to vector<32x32xf32>
    %11 = arith.addf %8, %10 : vector<32x32xf32>
    %c0_12 = arith.constant 0 : index
    %c0_13 = arith.constant 0 : index
    %12 = vector.load %arg5[%c0_12, %c0_13] : memref<32x16xbf16, #tpu.memory_space<vmem>>, vector<32x16xbf16>
    %13 = arith.extf %12 : vector<32x16xbf16> to vector<32x16xf32>
    %cst_14 = arith.constant dense<0.000000e+00> : vector<32x32xf32>
    %14 = tpu.matmul %13, %5, %cst_14 {dimension_numbers = #tpu.dot_dimension_numbers<[1], [0], [0], [1], [0, 0, 1, 1], [], []>} : vector<32x16xf32>, vector<16x32xf32>, vector<32x32xf32> -> vector<32x32xf32>
    %15 = arith.addf %14, %11 : vector<32x32xf32>
    %cst_15 = arith.constant 0.000000e+00 : f32
    %16 = vector.broadcast %cst_15 : f32 to vector<32x32xf32>
    %17 = arith.maximumf %15, %16 : vector<32x32xf32>
    %c0_16 = arith.constant 0 : index
    %c0_17 = arith.constant 0 : index
    %18 = vector.load %arg6[%c0_16, %c0_17] : memref<16x32xbf16, #tpu.memory_space<vmem>>, vector<16x32xbf16>
    %19 = arith.extf %18 : vector<16x32xbf16> to vector<16x32xf32>
    %cst_18 = arith.constant dense<0.000000e+00> : vector<16x32xf32>
    %20 = tpu.matmul %19, %17, %cst_18 {dimension_numbers = #tpu.dot_dimension_numbers<[1], [0], [0], [1], [0, 0, 1, 1], [], []>} : vector<16x32xf32>, vector<32x32xf32>, vector<16x32xf32> -> vector<16x32xf32>
    %c0_19 = arith.constant 0 : index
    %21 = memref.load %arg0[%c0_19] : memref<1xf32, #tpu.memory_space<smem>>
    %cst_20 = arith.constant 1.000000e+00 : f32
    %22 = arith.addf %cst_20, %21 : f32
    %23 = vector.broadcast %22 : f32 to vector<16x32xf32>
    %24 = arith.mulf %23, %5 : vector<16x32xf32>
    %25 = arith.addf %24, %20 : vector<16x32xf32>
    %c0_21 = arith.constant 0 : index
    %c0_22 = arith.constant 0 : index
    %26 = vector.load %arg10[%c0_21, %c0_22] : memref<32x64xf32, #tpu.memory_space<vmem>>, vector<32x64xf32>
    %cst_23 = arith.constant dense<0.000000e+00> : vector<16x64xf32>
    %27 = tpu.matmul %25, %26, %cst_23 {dimension_numbers = #tpu.dot_dimension_numbers<[1], [0], [0], [1], [0, 0, 1, 1], [], []>} : vector<16x32xf32>, vector<32x64xf32>, vector<16x64xf32> -> vector<16x64xf32>
    %c0_24 = arith.constant 0 : index
    %c0_25 = arith.constant 0 : index
    %28 = vector.load %arg11[%c0_24, %c0_25] : memref<1x64xf32, #tpu.memory_space<vmem>>, vector<1x64xf32>
    %29 = vector.broadcast %28 : vector<1x64xf32> to vector<16x64xf32>
    %30 = arith.addf %27, %29 : vector<16x64xf32>
    %cst_26 = arith.constant 0.000000e+00 : f32
    %31 = vector.broadcast %cst_26 : f32 to vector<16x64xf32>
    %32 = arith.maximumf %30, %31 : vector<16x64xf32>
    %c0_27 = arith.constant 0 : index
    %c0_28 = arith.constant 0 : index
    %33 = vector.load %arg12[%c0_27, %c0_28] : memref<64x32xf32, #tpu.memory_space<vmem>>, vector<64x32xf32>
    %cst_29 = arith.constant dense<0.000000e+00> : vector<16x32xf32>
    %34 = tpu.matmul %32, %33, %cst_29 {dimension_numbers = #tpu.dot_dimension_numbers<[1], [0], [0], [1], [0, 0, 1, 1], [], []>} : vector<16x64xf32>, vector<64x32xf32>, vector<16x32xf32> -> vector<16x32xf32>
    %c0_30 = arith.constant 0 : index
    %c0_31 = arith.constant 0 : index
    %35 = vector.load %arg13[%c0_30, %c0_31] : memref<1x32xf32, #tpu.memory_space<vmem>>, vector<1x32xf32>
    %36 = vector.broadcast %35 : vector<1x32xf32> to vector<16x32xf32>
    %37 = arith.addf %34, %36 : vector<16x32xf32>
    %cst_32 = arith.constant 0.000000e+00 : f32
    %38 = vector.broadcast %cst_32 : f32 to vector<16x32xf32>
    %39 = arith.maximumf %37, %38 : vector<16x32xf32>
    %c0_33 = arith.constant 0 : index
    %c0_34 = arith.constant 0 : index
    %40 = vector.load %arg4[%c0_33, %c0_34] : memref<8x16xbf16, #tpu.memory_space<vmem>>, vector<8x16xbf16>
    %41 = arith.extf %40 : vector<8x16xbf16> to vector<8x16xf32>
    %cst_35 = arith.constant dense<0.000000e+00> : vector<8x32xf32>
    %42 = tpu.matmul %41, %5, %cst_35 {dimension_numbers = #tpu.dot_dimension_numbers<[1], [0], [0], [1], [0, 0, 1, 1], [], []>} : vector<8x16xf32>, vector<16x32xf32>, vector<8x32xf32> -> vector<8x32xf32>
    %43 = arith.addf %42, %1 : vector<8x32xf32>
    %c0_36 = arith.constant 0 : index
    %c0_37 = arith.constant 0 : index
    %44 = vector.load %arg14[%c0_36, %c0_37] : memref<32x64xf32, #tpu.memory_space<vmem>>, vector<32x64xf32>
    %cst_38 = arith.constant dense<0.000000e+00> : vector<8x64xf32>
    %45 = tpu.matmul %43, %44, %cst_38 {dimension_numbers = #tpu.dot_dimension_numbers<[1], [0], [0], [1], [0, 0, 1, 1], [], []>} : vector<8x32xf32>, vector<32x64xf32>, vector<8x64xf32> -> vector<8x64xf32>
    %c0_39 = arith.constant 0 : index
    %c0_40 = arith.constant 0 : index
    %46 = vector.load %arg15[%c0_39, %c0_40] : memref<1x64xf32, #tpu.memory_space<vmem>>, vector<1x64xf32>
    %47 = vector.broadcast %46 : vector<1x64xf32> to vector<8x64xf32>
    %48 = arith.addf %45, %47 : vector<8x64xf32>
    %cst_41 = arith.constant 0.000000e+00 : f32
    %49 = vector.broadcast %cst_41 : f32 to vector<8x64xf32>
    %50 = arith.maximumf %48, %49 : vector<8x64xf32>
    %c0_42 = arith.constant 0 : index
    %c0_43 = arith.constant 0 : index
    %51 = vector.load %arg16[%c0_42, %c0_43] : memref<64x32xf32, #tpu.memory_space<vmem>>, vector<64x32xf32>
    %cst_44 = arith.constant dense<0.000000e+00> : vector<8x32xf32>
    %52 = tpu.matmul %50, %51, %cst_44 {dimension_numbers = #tpu.dot_dimension_numbers<[1], [0], [0], [1], [0, 0, 1, 1], [], []>} : vector<8x64xf32>, vector<64x32xf32>, vector<8x32xf32> -> vector<8x32xf32>
    %c0_45 = arith.constant 0 : index
    %c0_46 = arith.constant 0 : index
    %53 = vector.load %arg17[%c0_45, %c0_46] : memref<1x32xf32, #tpu.memory_space<vmem>>, vector<1x32xf32>
    %54 = vector.broadcast %53 : vector<1x32xf32> to vector<8x32xf32>
    %55 = arith.addf %52, %54 : vector<8x32xf32>
    %cst_47 = arith.constant 0.000000e+00 : f32
    %56 = vector.broadcast %cst_47 : f32 to vector<8x32xf32>
    %57 = arith.maximumf %55, %56 : vector<8x32xf32>
    %c0_48 = arith.constant 0 : index
    %c0_49 = arith.constant 0 : index
    %58 = vector.load %arg19[%c0_48, %c0_49] : memref<8x32xf32, #tpu.memory_space<vmem>>, vector<8x32xf32>
    tpu.vector_store %arg19[%c0_48, %c0_49], %57 {strides = array<i32>} : memref<8x32xf32, #tpu.memory_space<vmem>>, vector<8x32xf32>,
    %c0_50 = arith.constant 0 : index
    %c0_51 = arith.constant 0 : index
    %59 = vector.load %arg18[%c0_50, %c0_51] : memref<16x32xf32, #tpu.memory_space<vmem>>, vector<16x32xf32>
    tpu.vector_store %arg18[%c0_50, %c0_51], %39 {strides = array<i32>} : memref<16x32xf32, #tpu.memory_space<vmem>>, vector<16x32xf32>,
    return
  }
}

</mosaic_0001>

<bundles_post_ra>
// kernel: tpu_custom_call.1
= control target key start
LH: loop header
LB: loop body
LE: loop exit
PB: predicated region body
PF: predicated region fallthrough
CT: control target
= control target key end

     0   :  { %s1567_s0 = inlined_call_operand.<no memory space> [shape: f32[1], index: 0, kind: input, shape index: {}]   ;;  %s1568_s1 = inlined_call_operand.vmem [shape: f32[16,32], index: 1, kind: input, shape index: {}]   ;;  %s1569_s2 = inlined_call_operand.vmem [shape: f32[8,32], index: 2, kind: input, shape index: {}]   ;;  %s1570_s3 = inlined_call_operand.vmem [shape: bf16[16,8], index: 3, kind: input, shape index: {}]   ;;  %s1571_s4 = inlined_call_operand.vmem [shape: bf16[8,16], index: 4, kind: input, shape index: {}]   ;;  %s1572_s5 = inlined_call_operand.vmem [shape: bf16[32,16], index: 5, kind: input, shape index: {}]   ;;  %s1573_s6 = inlined_call_operand.vmem [shape: bf16[16,32], index: 6, kind: input, shape index: {}]   ;;  %s1574_s7 = inlined_call_operand.vmem [shape: f32[32,8], index: 7, kind: input, shape index: {}]   ;;  %s1575_s8 = inlined_call_operand.vmem [shape: f32[8,32], index: 8, kind: input, shape index: {}]   ;;  %s1576_s9 = inlined_call_operand.vmem [shape: f32[1,32], index: 9, kind: input, shape index: {}]   ;;  %s1577_s10 = inlined_call_operand.vmem [shape: f32[32,64], index: 10, kind: input, shape index: {}]   ;;  %s1578_s11 = inlined_call_operand.vmem [shape: f32[1,64], index: 11, kind: input, shape index: {}]   ;;  %s1579_s12 = inlined_call_operand.vmem [shape: f32[64,32], index: 12, kind: input, shape index: {}]   ;;  %s1580_s13 = inlined_call_operand.vmem [shape: f32[1,32], index: 13, kind: input, shape index: {}]   ;;  %s1581_s14 = inlined_call_operand.vmem [shape: f32[32,64], index: 14, kind: input, shape index: {}]   ;;  %s1582_s15 = inlined_call_operand.vmem [shape: f32[1,64], index: 15, kind: input, shape index: {}]   ;;  %s1583_s16 = inlined_call_operand.vmem [shape: f32[64,32], index: 16, kind: input, shape index: {}]   ;;  %s1584_s17 = inlined_call_operand.vmem [shape: f32[1,32], index: 17, kind: input, shape index: {}]   ;;  %s1585_s18 = inlined_call_operand.hbm [shape: f32[16,32], index: 18, kind: output, shape index: {0}]   ;;  %s1586_s19 = inlined_call_operand.hbm [shape: f32[8,32], index: 19, kind: output, shape index: {1}]  }
   0x1   :  { %1588 = sst [smem:[#allocation9_spill]] %s1567_s0 }
   0x2   :  { %1589 = sst [smem:[#allocation10_spill]] %s1568_s1 }
   0x3   :  { %1590 = sst [smem:[#allocation11_spill]] %s1569_s2 }
   0x4   :  { %1591 = sst [smem:[#allocation12_spill]] %s1570_s3 }
   0x5   :  { %26 = vsyncpa [#allocation4], 0  ;;  %s1592_s20 = sld [smem:[#allocation11_spill]]  ;;  %s1593_s22 = sld [smem:[#allocation12_spill]]  ;;  %vm71_vm0 = vcmask 64512  }
   0xb   :  { %v1367_v0 = vld [vmem:[%s1592_s20] sm:$0xff] }
   0xc   :  { %v967_v1 = vld [vmem:[%s1593_s22] sm:$0xff]   ;;  %1036 = vmatprep.subr.mxu0 %v1367_v0 }
   0xd   :  { %v968_v2 = vunpack.c.l.bf16 %v967_v1  ;;  %v969_v3 = vunpack.c.h.bf16 %v967_v1 }
   0xe   :  { %27 = vsyncpa [#allocation6], 0  ;;  %1037 = vmatpush3.msra.mxu0 %v1367_v0  ;;  %v159_v4 = vld [vmem:[%s1575_s8] sm:$0xff]  ;;  %v156_v6 = vld [vmem:[%s1574_s7 + $0x8] sm:$0xff]  ;;  %vm272_vm1 = vcmask 130048   ;;  %s1594_s1 = sld [smem:[#allocation10_spill]] }
   0xf   :  { %1038 = vmatprep.mubr.msk.f32.mxu0 %vm71_vm0, %v968_v2  ;;  %v155_v5 = vld [vmem:[%s1574_s7] sm:$0xff]  ;;  %1041 = vmatprep.subr.mxu1 %v159_v4  ;;  %v157_v9 = vld [vmem:[%s1574_s7 + $0x10] sm:$0xff]  ;;  %v158_v10 = vld [vmem:[%s1574_s7 + $0x18] sm:$0xff]  ;;  %vm378_vm2 = vcmask 261120   ;;  %v1257_v54 = vmov 0.0|0.0   ;;  %s1595_s26 = sld [smem:[#allocation9_spill]] }
  0x10   :  { %1039 = vmatmul.mubr.msk.f32.vlgmr.msra.gmra.mrb[0].mxu0 %vm71_vm0, %v969_v3  ;;  %1043 = vmatprep.mubr.msk.f32.mxu1 %vm71_vm0, %v155_v5  ;;  %v971_v7 = vld [vmem:[%s1572_s5] sm:$0xff]   ;;  %v982_v18 = vld [vmem:[%s1572_s5 + $0x8] sm:$0xff]   ;;  %v469_v51 = vld [vmem:[%s1577_s10 + $0x10] sm:$0xff]  ;;  %vm1258_vm3 = vmmov 0   ;;  %vm576_vm4 = vcmask 523264  }
  0x11   :  { %1042 = vmatpush3.msra.mxu1 %v159_v4  ;;  %v972_v8 = vunpack.c.l.bf16 %v971_v7  ;;  %v973_v19 = vunpack.c.h.bf16 %v971_v7  ;;  %v976_v20 = vunpack.c.l.bf16 %v982_v18  ;;  %v977_v21 = vunpack.c.h.bf16 %v982_v18  ;;  %v979_v26 = vld [vmem:[%s1573_s6] sm:$0xff]   ;;  %v468_v46 = vld [vmem:[%s1577_s10 + $0x8] sm:$0xff]  ;;  %v470_v52 = vld [vmem:[%s1577_s10 + $0x18] sm:$0xff] }
  0x12   :  { %1044 = vmatmul.mubr.msk.f32.vlgmr.msra.gmra.mrb[0].mxu1 %vm71_vm0, %v156_v6  ;;  %v980_v27 = vunpack.c.l.bf16 %v979_v26  ;;  %v944_v28 = vld [vmem:[%s1576_s9] ss:$0 sm:$0xff]  ;;  %v981_v50 = vunpack.c.h.bf16 %v979_v26  ;;  %v1153_v53 = vpack.c.bf16 %v470_v52, %v469_v51  ;;  %v562_v56 = vld [vmem:[%s1579_s12 + $0x8] sm:$0xff]  ;;  %v563_v57 = vld [vmem:[%s1579_s12 + $0x10] sm:$0xff] }
  0x13   :  { %1046 = vmatprep.mubr.msk.f32.mxu1 %vm71_vm0, %v157_v9  ;;  %1053 = vmatprep.mubr.msk.f32.mxu0 %vm272_vm1, %v972_v8  ;;  %v467_v45 = vld [vmem:[%s1577_s10] sm:$0xff]  ;;  %v564_v59 = vld [vmem:[%s1579_s12 + $0x18] sm:$0xff]  ;;  %v566_v62 = vld [vmem:[%s1579_s12 + $0x28] sm:$0xff] }
  0x14   :  { %v65_v11 = vld [vmem:[%s1594_s1 + $0x8] sm:$0xff]  ;;  %v64_v12 = vld [vmem:[%s1594_s1] sm:$0xff]  ;;  %v1149_v49 = vpack.c.bf16 %v468_v46, %v467_v45  ;;  %v1161_v60 = vpack.c.bf16 %v564_v59, %v563_v57  ;;  %v738_v18 = vld [vmem:[%s1581_s14 + $0x18] sm:$0xff] }
  0x15   :  { %v561_v55 = vld [vmem:[%s1579_s12] sm:$0xff]  ;;  %s461_s9 = sadd.f32 1.0, %s1595_s26 }
  0x16   :  { %1047 = vmatmul.mubr.msk.f32.gmra.mrb[2].mxu1 %vm71_vm0, %v158_v10  ;;  %v1157_v58 = vpack.c.bf16 %v562_v56, %v561_v55  ;;  %v565_v61 = vld [vmem:[%s1579_s12 + $0x20] sm:$0xff]  ;;  %v1259_v10 = vmov 0.0  }
  0x17   :  { %v1165_v63 = vpack.c.bf16 %v566_v62, %v565_v61  ;;  %v462_v1 = vstv %s461_s9  ;;  %v660_v8 = vld [vmem:[%s1571_s4] sm:$0xf] }
  0x18   :  { %1158 = vmatprep.subr.bf16.mxu1 %v1157_v58  ;;  %v661_v9 = vunpack.c.l.bf16 %v660_v8 }
  0x19   :  { %1160 = vmatpush3.bf16.msra.mxu1 %v1157_v58 }
  0x1a   :  { %1162 = vmatprep.subr.bf16.mxu1 %v1161_v60 }
  0x1d   :  { %1164 = vmatpush3.bf16.msra.mxu1 %v1161_v60 }
  0x1e   :  { %1166 = vmatprep.subr.bf16.mxu1 %v1165_v63 }
  0x21   :  { %1168 = vmatpush3.bf16.msra.mxu1 %v1165_v63 }
  0xe3   :  { %v1040_v13 = vpop.f32.mrb[0].mxu0 }
  0xe4   :  { %v1405_v14 = vadd.f32 %v1040_v13, %v65_v11  ;;  %v144_v15 = vpop.f32.mrb[1].mxu0  ;;  %v735_v11 = vld [vmem:[%s1581_s14] sm:$0xff] }
  0xe5   :  { %v1407_v16 = vadd.f32 %v144_v15, %v64_v12  ;;  %v1045_v22 = vpop.f32.mrb[0].mxu1  ;;  %v736_v12 = vld [vmem:[%s1581_s14 + $0x8] sm:$0xff]  ;;  %v568_v15 = vld [vmem:[%s1579_s12 + $0x38] sm:$0xff] }
  0xe6   :  { %v245_v23 = vpop.f32.mrb[1].mxu1  ;;  %v251_v29 = vadd.f32 %v1045_v22, %v944_v28  ;;  %v464_v2 = vmul.f32 %v462_v1, %v1405_v14  ;;  %v1177_v13 = vpack.c.bf16 %v736_v12, %v735_v11 }
  0xe7   :  { %v1411_v17 = vpack.c.bf16 %v1405_v14, %v1407_v16  ;;  %v246_v30 = vadd.f32 %v944_v28, %v245_v23  ;;  %v463_v4 = vmul.f32 %v462_v1, %v1407_v16  ;;  %v567_v14 = vld [vmem:[%s1579_s12 + $0x30] sm:$0xff] }
  0xe8   :  { %v1169_v16 = vpack.c.bf16 %v568_v15, %v567_v14 }
  0xe9   :  { %1138 = vmatprep.subr.bf16.mxu0 %v1411_v17  ;;  %v1048_v24 = vpop.f32.mrb[2].mxu1 }
  0xea   :  { %1140 = vmatpush3.bf16.msra.mxu0 %v1411_v17  ;;  %v255_v25 = vpop.f32.mrb[3].mxu1  ;;  %v261_v33 = vadd.f32 %v1048_v24, %v944_v28  ;;  %1170 = vmatprep.subr.bf16.mxu1 %v1169_v16  ;;  %v820_v24 = vld [vmem:[%s1583_s16] sm:$0xff] }
  0xeb   :  { %v256_v36 = vadd.f32 %v944_v28, %v255_v25  ;;  %1172 = vmatpush3.bf16.msra.mxu1 %v1169_v16  ;;  %v821_v25 = vld [vmem:[%s1583_s16 + $0x8] sm:$0xff] }
  0xec   :  { %1182 = vmatprep.subr.bf16.mxu1 %v1257_v54 }
  0xed   :  { %1054 = vmatmul.mubr.msk.f32.vlgmr.msra.gmra.mrb[2].mxu0 %vm272_vm1, %v973_v19 }
  0xee   :  { %1056 = vmatprep.mubr.msk.f32.mxu0 %vm272_vm1, %v976_v20  ;;  %v955_v20 = vld [vmem:[%s1578_s11] ss:$0 sm:$0xff] }
  0xf1   :  { %1057 = vmatmul.mubr.msk.f32.gmra.mrb[4].mxu0 %vm272_vm1, %v977_v21 }
  0xf2   :  { %1067 = vmatprep.mubr.msk.f32.mxu0 %vm378_vm2, %v980_v27 }
 0x1c0   :  { %v1055_v31 = vpop.f32.mrb[2].mxu0 }
 0x1c1   :  { %v357_v32 = vadd.f32 %v1055_v31, %v251_v29  ;;  %v351_v34 = vpop.f32.mrb[3].mxu0  ;;  %v1183_v29 = vpack.c.bf16 %v821_v25, %v820_v24 }
 0x1c2   :  { %v352_v35 = vadd.f32 %v351_v34, %v246_v30  ;;  %v823_v34 = vld [vmem:[%s1583_s16 + $0x18] sm:$0xff] }
 0x1c3   :  { %v371_v37 = vmax.f32 %v357_v32, 0.0 }
 0x1c4   :  { %v370_v38 = vmax.f32 %v352_v35, 0.0  ;;  %v1058_v39 = vpop.f32.mrb[4].mxu0 }
 0x1c5   :  { %v367_v40 = vadd.f32 %v1058_v39, %v261_v33  ;;  %v361_v41 = vpop.f32.mrb[5].mxu0  ;;  %v822_v33 = vld [vmem:[%s1583_s16 + $0x10] sm:$0xff]  ;;  %v827_v39 = vld [vmem:[%s1583_s16 + $0x38] sm:$0xff] }
 0x1c6   :  { %v1141_v42 = vpack.c.bf16 %v371_v37, %v370_v38  ;;  %v362_v43 = vadd.f32 %v361_v41, %v256_v36  ;;  %v1186_v35 = vpack.c.bf16 %v823_v34, %v822_v33  ;;  %v825_v36 = vld [vmem:[%s1583_s16 + $0x28] sm:$0xff]  ;;  %v826_v38 = vld [vmem:[%s1583_s16 + $0x30] sm:$0xff]  ;;  %v958_v41 = vld [vmem:[%s1580_s13] ss:$0 sm:$0xff]  ;;  %s1260_s13 = smov [#allocation3]  }
 0x1c7   :  { %v373_v44 = vmax.f32 %v367_v40, 0.0  ;;  %v1192_v40 = vpack.c.bf16 %v827_v39, %v826_v38 }
 0x1c8   :  { %v372_v47 = vmax.f32 %v362_v43, 0.0  ;;  %1142 = vmatprep.subr.bf16.mxu0 %v1141_v42 }
 0x1c9   :  { %1144 = vmatpush3.bf16.msra.mxu0 %v1141_v42  ;;  %v962_v42 = vld [vmem:[%s1582_s15] ss:$0 sm:$0xff] }
 0x1ca   :  { %v1145_v48 = vpack.c.bf16 %v373_v44, %v372_v47 }
 0x1cc   :  { %1146 = vmatprep.subr.bf16.mxu0 %v1145_v48 }
 0x1cd   :  { %1148 = vmatpush3.bf16.msra.mxu0 %v1145_v48 }
 0x1ce   :  { %1150 = vmatprep.subr.bf16.mxu0 %v1149_v49 }
 0x1d0   :  { %1068 = vmatmul.mubr.msk.f32.vlgmr.msra.gmra.mrb[6].mxu0 %vm378_vm2, %v981_v50 }
 0x1d1   :  { %1152 = vmatpush3.bf16.msra.mxu0 %v1149_v49 }
 0x1d2   :  { %1154 = vmatprep.subr.bf16.mxu0 %v1153_v53 }
 0x1d5   :  { %1156 = vmatpush3.bf16.msra.mxu0 %v1153_v53 }
 0x1d6   :  { %1173 = vmatprep.subr.bf16.mxu0 %v1257_v54 }
 0x2a3   :  { %v1069_v3 = vpop.f32.mrb[6].mxu0 }
 0x2a4   :  { %v466_v5 = vadd.f32 %v1069_v3, %v464_v2  ;;  %v451_v6 = vpop.f32.mrb[7].mxu0 }
 0x2a5   :  { %v465_v7 = vadd.f32 %v463_v4, %v451_v6 }
 0x2a7   :  { %1078 = vmatprep.mubr.msk.f32.mxu0 %vm378_vm2, %v465_v7 }
 0x2a8   :  { %1079 = vmatmul.mubr.msk.f32.vlgmr.msra.gmra.mrb[8].mxu0 %vm378_vm2, %v466_v5 }
 0x2a9   :  { %1175 = vmatpush3.bf16.msra.mxu0 %v1411_v17  ;;  %1104 = vmatprep.mubr.msk.f32.mxu0 %vm1258_vm3, %v1259_v10  ;;  %v737_v17 = vld [vmem:[%s1581_s14 + $0x10] sm:$0xff] }
 0x2aa   :  { %1176 = vmatprep.subr.bf16.mxu0 %v1257_v54  ;;  %v1180_v19 = vpack.c.bf16 %v738_v18, %v737_v17 }
 0x2ac   :  { %1105 = vmatmul.mubr.msk.f32.vlgmr.msra.gmra.mrb[10].mxu0 %vm272_vm1, %v661_v9 }
 0x2ad   :  { %1115 = vmatprep.mubr.msk.f32.mxu0 %vm1258_vm3, %v1259_v10  ;;  %1178 = vmatpush3.bf16.msra.mxu0 %v1177_v13 }
 0x2ae   :  { %1179 = vmatprep.subr.bf16.mxu0 %v1257_v54 }
 0x2b1   :  { %1181 = vmatpush3.bf16.msra.mxu0 %v1180_v19 }
 0x37b   :  { %v1080_v21 = vpop.f32.mrb[8].mxu0 }
 0x37c   :  { %v556_v22 = vadd.f32 %v1080_v21, %v955_v20  ;;  %v550_v23 = vpop.f32.mrb[9].mxu0 }
 0x37d   :  { %v551_v26 = vadd.f32 %v955_v20, %v550_v23 }
 0x37e   :  { %v560_v30 = vmax.f32 %v556_v22, 0.0 }
 0x37f   :  { %v559_v27 = vmax.f32 %v551_v26, 0.0  ;;  %v731_v28 = vpop.f32.mrb[10].mxu0 }
 0x380   :  { %v732_v31 = vadd.f32 %v731_v28, %v1367_v0  ;;  %v1106_v32 = vpop.f32.mrb[11].mxu0  ;;  %v824_v0 = vld [vmem:[%s1583_s16 + $0x20] sm:$0xff]  ;;  %s917_s16 = sshll.u32 %s1260_s13, 4  ;;  %s918_s16 = int_to_ptr.vmem [resolvable:$true] %s917_s16 }
 0x381   :  { %1097 = vmatprep.mubr.msk.f32.mxu1 %vm576_vm4, %v559_v27  ;;  %v1189_v37 = vpack.c.bf16 %v825_v36, %v824_v0  ;;  %s1209_s15 = scalar_lea.vmem %s918_s16, 256  ;;  %p1214_p1 = scmp.lt.s32.totalorder %s918_s16, %s918_s16 }
 0x382   :  { %1098 = vmatmul.mubr.msk.f32.vlgmr.msra.gmra.mrb[4].mxu1 %vm576_vm4, %v560_v30  ;;  %1116 = vmatmul.mubr.msk.f32.vlgmr.msra.gmra.mrb[12].mxu0 %vm378_vm2, %v732_v31  ;;  %p1210_p0 = scmp.ne.s32.totalorder %s918_s16, %s1209_s15  ;;  %p1215_p2 = scmp.lt.s32.totalorder %s1209_s15, %s1209_s15 }
 0x383   :  { %1184 = vmatpush3.bf16.msra.mxu1 %v1183_v29  ;;  %1134 = vmatprep.mubr.msk.f32.mxu1 %vm1258_vm3, %v1259_v10 }
 0x384   :  { %1185 = vmatprep.subr.bf16.mxu1 %v1257_v54  ;;  %p1216_p3 = por %p1215_p2, %p1214_p1 }
 0x386   :  { %p1217_p4 = pnand %p1216_p3, %p1210_p0 }
 0x387   :  { %1187 = vmatpush3.bf16.msra.mxu1 %v1186_v35 }
 0x388   :  { %1188 = vmatprep.subr.bf16.mxu1 %v1257_v54 }
 0x38b   :  { %1190 = vmatpush3.bf16.msra.mxu1 %v1189_v37 }
 0x38c   :  { %1191 = vmatprep.subr.bf16.mxu1 %v1257_v54 }
 0x38f   :  { %1193 = vmatpush3.bf16.msra.mxu1 %v1192_v40 }
 0x455   :  { %v1099_v43 = vpop.f32.mrb[4].mxu1  ;;  %v815_v44 = vpop.f32.mrb[12].mxu0 }
 0x456   :  { %v655_v45 = vadd.f32 %v1099_v43, %v958_v41  ;;  %v816_v46 = vadd.f32 %v962_v42, %v815_v44  ;;  %v649_v47 = vpop.f32.mrb[5].mxu1  ;;  %v1117_v48 = vpop.f32.mrb[13].mxu0 }
 0x457   :  { %v650_v49 = vadd.f32 %v958_v41, %v649_v47 }
 0x458   :  { %v659_v50 = vmax.f32 %v655_v45, 0.0  ;;  %v819_v51 = vmax.f32 %v816_v46, 0.0 }
 0x459   :  { %v658_v52 = vmax.f32 %v650_v49, 0.0 }
 0x45a   :  { %911 = vst.msk [vmem:[#allocation3 + $0x8] sm:$0xff] %vm378_vm2, %v659_v50  ;;  %1135 = vmatmul.mubr.msk.f32.vlgmr.msra.gmra.mrb[6].mxu1 %vm576_vm4, %v819_v51 }
 0x45b   :  { %910 = vst.msk [vmem:[#allocation3] sm:$0xff] %vm378_vm2, %v658_v52 }
 0x45c   :  { %1220 = shalt.err (!%p1217_p4)
}
 0x45d   :  { %s1221_s7 = scalar_lea.hbm %s1585_s18, 256 }
 0x45e   :  { %p1222_p5 = scmp.ne.s32.totalorder %s1585_s18, %s1221_s7  ;;  %p1225_p6 = scmp.lt.u32.totalorder %s1221_s7, %s1585_s18 }
 0x460   :  { %p1227_p7 = pnand %p1225_p6, %p1222_p5 }
 0x462   :  { %1230 = shalt.err (!%p1227_p7)
}
 0x463   :  { %s1261_s5 = smov 128   ;;  %s1262_s3 = smov 8   ;;  %v964_v53 = vld [vmem:[%s1584_s17] ss:$0 sm:$0xff] }
 0x464   :  { %923 = dma.vmem_to_hbm [thread:$0]  %s918_s16, 256, %s1585_s18, [#allocation4], %s1261_s5, %s1261_s5, %s1262_s3  }
 0x465   :  { %s1263_s9 = smov [#allocation5]  }
 0x466   :  { %s930_s27 = sshll.u32 %s1263_s9, 4  ;;  %s931_s27 = int_to_ptr.vmem [resolvable:$true] %s930_s27 }
 0x467   :  { %s1231_s28 = scalar_lea.vmem %s931_s27, 128  ;;  %p1236_p9 = scmp.lt.s32.totalorder %s931_s27, %s931_s27 }
 0x468   :  { %p1232_p8 = scmp.ne.s32.totalorder %s931_s27, %s1231_s28  ;;  %p1237_p10 = scmp.lt.s32.totalorder %s1231_s28, %s1231_s28 }
 0x46a   :  { %p1238_p11 = por %p1237_p10, %p1236_p9 }
 0x46c   :  { %p1239_p12 = pnand %p1238_p11, %p1232_p8 }
 0x52d   :  { %v904_v54 = vpop.f32.mrb[6].mxu1 }
 0x52e   :  { %v905_v55 = vadd.f32 %v964_v53, %v904_v54  ;;  %v1136_v56 = vpop.f32.mrb[7].mxu1 }
 0x530   :  { %v908_v57 = vmax.f32 %v905_v55, 0.0 }
 0x532   :  { %909 = vst.msk [vmem:[#allocation5] sm:$0xff] %vm378_vm2, %v908_v57 }
 0x533   :  { %1242 = shalt.err (!%p1239_p12)
}
 0x534   :  { %s1243_s17 = scalar_lea.hbm %s1586_s19, 128 }
 0x535   :  { %p1244_p13 = scmp.ne.s32.totalorder %s1586_s19, %s1243_s17  ;;  %p1247_p0 = scmp.lt.u32.totalorder %s1243_s17, %s1586_s19 }
 0x537   :  { %p1249_p1 = pnand %p1247_p0, %p1244_p13 }
 0x539   :  { %1252 = shalt.err (!%p1249_p1)
}
 0x53a   :  { %933 = dma.vmem_to_hbm [thread:$0]  %s931_s27, 128, %s1586_s19, [#allocation6]  }
 0x53b   :  { %1253 = dma.done.wait [#allocation4], 256  }
 0x53c   :  { %1254 = vsyncadd [#allocation4], 4294967040 }
 0x53d   :  { %1255 = dma.done.wait [#allocation6], 128  }
 0x53e   :  { %1256 = vsyncadd [#allocation6], 4294967168 }
 0x53f   :  { %940 = vsyncpa [#allocation4], 1 }
 0x540   :  { %941 = vsyncpa [#allocation6], 1 }

</bundles_post_ra>
